<compile_context>
chip_gen: v7x
topology: tpu7x:2x2x1
jax: 0.10.0
libtpu: 0.0.40
codegen_flags: <defaults>
</compile_context>

<pallas_src>
import functools

import jax
import jax.numpy as jnp
from jax import lax
from jax.experimental import pallas as pl
from jax.experimental.pallas import tpu as pltpu

_LANES = 128


def _as_rows128(x):
    """Flatten to (rows, 128).  Free (bitcast) reshape when size % 128 == 0."""
    flat = jnp.reshape(x, (-1,))
    rem = flat.shape[0] % _LANES
    if rem:
        # TODO(synk): non-128-divisible inputs take a one-off pad copy; could be
        #             avoided with 1-D blocking + full in-kernel masking.
        flat = jnp.pad(flat, (0, _LANES - rem))
    return jnp.reshape(flat, (-1, _LANES))


def _rainloss_kernel(prev_ref, now_ref, dr_ref, db_ref, o_ref, acc_ref, *,
                     block_rows, inner, rows, inv_n, bsize_f, needs_mask):
    """Grid = (num_splits, inner).  Axis 0 is parallel (per-TensorCore half),
    axis 1 walks row blocks of the bg tensors (arbitrary / reduction).

    prev_ref / now_ref : (block_rows, 128) blocks of the flattened bg tensors.
    dr_ref / db_ref    : (B, 1) resident discriminator outputs.
    o_ref              : (1, 1, 1) per-split partial of the final loss.
    acc_ref            : (8, 128) f32 running per-lane partial sums.
    """
    c = pl.program_id(0)
    k = pl.program_id(1)

    @pl.when(k == 0)
    def _init():
        acc_ref[...] = jnp.zeros_like(acc_ref)

    # Upcast after the (possibly bf16) DMA; |prev - now| in f32.
    diff = jnp.abs(prev_ref[...].astype(jnp.float32) -
                   now_ref[...].astype(jnp.float32))

    if needs_mask:
        # Zero out rows past the true extent (partial / clamped last blocks).
        step = c * inner + k
        row_ids = step * block_rows + lax.broadcasted_iota(
            jnp.int32, (block_rows, _LANES), 0)
        diff = jnp.where(row_ids < rows, diff, 0.0)

    if block_rows % 8 == 0:
        # Pure vreg adds into the (8,128) accumulator; no per-step XLU reduce.
        acc_ref[...] += diff.reshape(block_rows // 8, 8, _LANES).sum(axis=0)
    else:
        # Single small (full-array) block that isn't sublane-aligned.
        acc_ref[0:1, :] += diff.sum(axis=0, keepdims=True)

    @pl.when(k == inner - 1)
    def _finalize():
        # One cross-lane/sublane reduction per split, plus the 0.4/0.3 scaling.
        l1_part = jnp.sum(acc_ref[...]) * (0.4 * inv_n)
        d_rain = dr_ref[...].astype(jnp.float32)
        d_bg = db_ref[...].astype(jnp.float32)
        # 0.3*sum(1 - D_rain) + 0.3*sum(D_bg) = 0.3*B + 0.3*sum(D_bg - D_rain)
        d_part = 0.3 * bsize_f + 0.3 * jnp.sum(d_bg - d_rain)
        total = l1_part + jnp.where(c == 0, d_part, 0.0)
        o_ref[...] = jnp.reshape(total, (1, 1, 1))


def rain_loss(bg_prev, bg_now, rain_now, D_rain, D_bg, *, max_block_rows=2048):
    """JAX wrapper.  Returns shape (1,) like the PyTorch module."""
    del rain_now  # unused by the PyTorch forward

    bg_prev = jnp.asarray(bg_prev)
    bg_now = jnp.asarray(bg_now)
    D_rain = jnp.asarray(D_rain)
    D_bg = jnp.asarray(D_bg)
    if bg_prev.shape != bg_now.shape:
        raise ValueError("bg_prev and bg_now must have the same shape")

    n_elems = bg_prev.size
    bsize = D_rain.shape[0]
    # The original loop `term_2 += 1 - D_rain[b]` only yields a scalar loss if
    # the discriminator emits one value per sample.
    if D_rain.size != bsize or D_bg.size != bsize:
        raise ValueError("RainLoss expects one discriminator value per sample")

    prev2d = _as_rows128(bg_prev)
    now2d = _as_rows128(bg_now)
    rows = prev2d.shape[0]

    # Row-block tiling (per-generation safe: 2048*128*4B = 1 MiB per buffer).
    if rows <= max_block_rows:
        block_rows = rows          # full extent -> always a legal block shape
        total_blocks = 1
    else:
        block_rows = max_block_rows  # multiple of 8 and lane-dense
        total_blocks = pl.cdiv(rows, block_rows)

    num_splits = 2 if total_blocks >= 2 else 1   # v7x: one half per TensorCore
    inner = pl.cdiv(total_blocks, num_splits)
    covered = num_splits * inner
    needs_mask = (block_rows * total_blocks != rows) or (covered != total_blocks)

    if covered == total_blocks:
        bg_index_map = lambda c, k: (c * inner + k, 0)
    else:
        last_block = total_blocks - 1
        # Clamp fully-out-of-range steps onto the last valid block; their
        # contribution is zeroed by the in-kernel row mask.
        bg_index_map = lambda c, k: (jnp.minimum(c * inner + k, last_block), 0)

    d_rain2d = jnp.reshape(D_rain, (bsize, 1))
    d_bg2d = jnp.reshape(D_bg, (bsize, 1))

    kernel = functools.partial(
        _rainloss_kernel,
        block_rows=block_rows,
        inner=inner,
        rows=rows,
        inv_n=1.0 / float(n_elems),
        bsize_f=float(bsize),
        needs_mask=needs_mask,
    )

    bg_bytes = 2 * n_elems * bg_prev.dtype.itemsize
    cost = pl.CostEstimate(
        flops=3 * n_elems,
        transcendentals=0,
        bytes_accessed=bg_bytes + 2 * bsize * 4 + num_splits * 4,
    )

    partials = pl.pallas_call(
        kernel,
        out_shape=jax.ShapeDtypeStruct((num_splits, 1, 1), jnp.float32),
        grid=(num_splits, inner),
        in_specs=[
            pl.BlockSpec((block_rows, _LANES), bg_index_map),   # bg_prev blocks
            pl.BlockSpec((block_rows, _LANES), bg_index_map),   # bg_now  blocks
            pl.BlockSpec(memory_space=pltpu.MemorySpace.VMEM),  # D_rain resident
            pl.BlockSpec(memory_space=pltpu.MemorySpace.VMEM),  # D_bg   resident
        ],
        out_specs=pl.BlockSpec((1, 1, 1), lambda c, k: (c, 0, 0)),
        scratch_shapes=[pltpu.VMEM((8, _LANES), jnp.float32)],
        compiler_params=pltpu.CompilerParams(
            dimension_semantics=("parallel", "arbitrary")),
        cost_estimate=cost,
    )(prev2d, now2d, d_rain2d, d_bg2d)

    # <=2 per-core partials -> scalar loss of shape (1,).
    return jnp.sum(partials).reshape(1)


def _reference(bg_prev, bg_now, D_rain, D_bg):
    term1 = jnp.mean(jnp.abs(bg_prev - bg_now))
    term2 = jnp.sum(1.0 - D_rain)
    term3 = jnp.sum(D_bg)
    return 0.4 * term1 + 0.3 * term2 + 0.3 * term3


if __name__ == "__main__":
    bsize, C, H, W = 2, 3, 16, 16

    key = jax.random.PRNGKey(0)
    k0, k1, k2, k3, k4 = jax.random.split(key, 5)

    bg_prev = jax.random.normal(k0, (bsize, C, H, W), jnp.float32)
    bg_now = jax.random.normal(k1, (bsize, C, H, W), jnp.float32)
    rain_now = jax.random.normal(k2, (bsize, C, H, W), jnp.float32)
    # Discriminator outputs: one scalar per sample, shape (B, 1).
    D_rain = jax.nn.sigmoid(jax.random.normal(k3, (bsize, 1), jnp.float32))
    D_bg = jax.nn.sigmoid(jax.random.normal(k4, (bsize, 1), jnp.float32))

    # 1) Small single-block path.
    out = rain_loss(bg_prev, bg_now, rain_now, D_rain, D_bg)
    out = jax.block_until_ready(out)
    ref = _reference(bg_prev, bg_now, D_rain, D_bg)
    assert out.shape == (1,)
    assert jnp.allclose(out[0], ref, rtol=1e-5, atol=1e-5), (out, ref)

    # 2) Gridded / split / masked path (small data, forced tiny block size).
    H2 = W2 = 64
    bg_prev2 = jax.random.normal(k0, (bsize, C, H2, W2), jnp.float32)
    bg_now2 = jax.random.normal(k1, (bsize, C, H2, W2), jnp.float32)
    out2 = rain_loss(bg_prev2, bg_now2, None, D_rain, D_bg, max_block_rows=64)
    out2 = jax.block_until_ready(out2)
    ref2 = _reference(bg_prev2, bg_now2, D_rain, D_bg)
    assert out2.shape == (1,)
    assert jnp.allclose(out2[0], ref2, rtol=1e-5, atol=1e-5), (out2, ref2)

    print("KERNEL_OK")
</pallas_src>

<mosaic_0001>
module attributes {stable_mosaic.version = 11 : i64} {
  func.func @_rainloss_kernel(%arg0: i32, %arg1: i32, %arg2: memref<12x128xf32, #tpu.memory_space<vmem>>, %arg3: memref<12x128xf32, #tpu.memory_space<vmem>>, %arg4: memref<2x1xf32, #tpu.memory_space<vmem>>, %arg5: memref<2x1xf32, #tpu.memory_space<vmem>>, %arg6: memref<1x1x1xf32, #tpu.memory_space<vmem>>, %arg7: memref<8x128xf32, #tpu.memory_space<vmem>>) attributes {dimension_semantics = [#tpu.dimension_semantics<parallel>, #tpu.dimension_semantics<arbitrary>], iteration_bounds = array<i64: 1, 1>, scalar_prefetch = 0 : i64, scratch_operands = 1 : i64, tpu.core_type = #tpu.core_type<tc>, window_params = [{transform_indices = @transform_0, window_bounds = array<i64: 12, 128>}, {transform_indices = @transform_1, window_bounds = array<i64: 12, 128>}, {pipeline_mode = #tpu.pipeline_mode<synchronous>, transform_indices = @transform_2, window_bounds = array<i64: 2, 1>}, {pipeline_mode = #tpu.pipeline_mode<synchronous>, transform_indices = @transform_3, window_bounds = array<i64: 2, 1>}, {transform_indices = @transform_4, window_bounds = array<i64: 1, 1, 1>}]} {
    %c0_i32 = arith.constant 0 : i32
    %0 = arith.cmpi eq, %arg1, %c0_i32 : i32
    %1 = arith.extui %0 : i1 to i32
    %c0_i32_0 = arith.constant 0 : i32
    %2 = arith.cmpi ne, %1, %c0_i32_0 : i32
    scf.if %2 {
      %cst_10 = arith.constant 0.000000e+00 : f32
      %15 = vector.broadcast %cst_10 : f32 to vector<8x128xf32>
      %c0_11 = arith.constant 0 : index
      %c0_12 = arith.constant 0 : index
      %16 = vector.load %arg7[%c0_11, %c0_12] : memref<8x128xf32, #tpu.memory_space<vmem>>, vector<8x128xf32>
      tpu.vector_store %arg7[%c0_11, %c0_12], %15 {strides = array<i32>} : memref<8x128xf32, #tpu.memory_space<vmem>>, vector<8x128xf32>,
    } else {
    }
    %c0 = arith.constant 0 : index
    %c0_1 = arith.constant 0 : index
    %3 = vector.load %arg2[%c0, %c0_1] : memref<12x128xf32, #tpu.memory_space<vmem>>, vector<12x128xf32>
    %c0_2 = arith.constant 0 : index
    %c0_3 = arith.constant 0 : index
    %4 = vector.load %arg3[%c0_2, %c0_3] : memref<12x128xf32, #tpu.memory_space<vmem>>, vector<12x128xf32>
    %5 = arith.subf %3, %4 : vector<12x128xf32>
    %6 = math.absf %5 : vector<12x128xf32>
    %c0_4 = arith.constant 0 : index
    %c0_5 = arith.constant 0 : index
    %7 = vector.load %arg7[%c0_4, %c0_5] : memref<8x128xf32, #tpu.memory_space<vmem>>, vector<1x128xf32>
    %cst = arith.constant dense<0.000000e+00> : vector<128xf32>
    %8 = vector.multi_reduction <add>, %6, %cst [0] : vector<12x128xf32> to vector<128xf32>
    %9 = vector.shape_cast %8 : vector<128xf32> to vector<1x128xf32>
    %10 = arith.addf %7, %9 : vector<1x128xf32>
    %c0_6 = arith.constant 0 : index
    %c0_7 = arith.constant 0 : index
    %11 = vector.load %arg7[%c0_6, %c0_7] : memref<8x128xf32, #tpu.memory_space<vmem>>, vector<1x128xf32>
    tpu.vector_store %arg7[%c0_6, %c0_7], %10 {strides = array<i32>} : memref<8x128xf32, #tpu.memory_space<vmem>>, vector<1x128xf32>,
    %c0_i32_8 = arith.constant 0 : i32
    %12 = arith.cmpi eq, %arg1, %c0_i32_8 : i32
    %13 = arith.extui %12 : i1 to i32
    %c0_i32_9 = arith.constant 0 : i32
    %14 = arith.cmpi ne, %13, %c0_i32_9 : i32
    scf.if %14 {
      %c0_10 = arith.constant 0 : index
      %c0_11 = arith.constant 0 : index
      %15 = vector.load %arg7[%c0_10, %c0_11] : memref<8x128xf32, #tpu.memory_space<vmem>>, vector<8x128xf32>
      %16 = vector.shape_cast %15 : vector<8x128xf32> to vector<1x8x128xf32>
      %cst_12 = arith.constant dense<0.000000e+00> : vector<1xf32>
      %17 = vector.multi_reduction <add>, %16, %cst_12 [1, 2] : vector<1x8x128xf32> to vector<1xf32>
      %18 = vector.shape_cast %17 : vector<1xf32> to vector<1x1x1xf32>
      %19 = vector.extract %18[0, 0, 0] : f32 from vector<1x1x1xf32>
      %cst_13 = arith.constant 2.6041668E-4 : f32
      %20 = arith.mulf %19, %cst_13 : f32
      %c0_14 = arith.constant 0 : index
      %c0_15 = arith.constant 0 : index
      %21 = vector.load %arg4[%c0_14, %c0_15] : memref<2x1xf32, #tpu.memory_space<vmem>>, vector<2x1xf32>
      %c0_16 = arith.constant 0 : index
      %c0_17 = arith.constant 0 : index
      %22 = vector.load %arg5[%c0_16, %c0_17] : memref<2x1xf32, #tpu.memory_space<vmem>>, vector<2x1xf32>
      %23 = arith.subf %22, %21 : vector<2x1xf32>
      %24 = vector.shape_cast %23 : vector<2x1xf32> to vector<1x2x1xf32>
      %cst_18 = arith.constant dense<0.000000e+00> : vector<1xf32>
      %25 = vector.multi_reduction <add>, %24, %cst_18 [1, 2] : vector<1x2x1xf32> to vector<1xf32>
      %26 = vector.shape_cast %25 : vector<1xf32> to vector<1x1x1xf32>
      %27 = vector.extract %26[0, 0, 0] : f32 from vector<1x1x1xf32>
      %cst_19 = arith.constant 3.000000e-01 : f32
      %28 = arith.mulf %cst_19, %27 : f32
      %cst_20 = arith.constant 6.000000e-01 : f32
      %29 = arith.addf %cst_20, %28 : f32
      %c0_i32_21 = arith.constant 0 : i32
      %30 = arith.cmpi eq, %arg0, %c0_i32_21 : i32
      %cst_22 = arith.constant 0.000000e+00 : f32
      %31 = arith.select %30, %29, %cst_22 : f32
      %32 = arith.addf %20, %31 : f32
      %33 = vector.broadcast %32 : f32 to vector<1x1x1xf32>
      %c0_23 = arith.constant 0 : index
      %c0_24 = arith.constant 0 : index
      %c0_25 = arith.constant 0 : index
      %34 = vector.load %arg6[%c0_23, %c0_24, %c0_25] : memref<1x1x1xf32, #tpu.memory_space<vmem>>, vector<1x1x1xf32>
      tpu.vector_store %arg6[%c0_23, %c0_24, %c0_25], %33 {strides = array<i32>} : memref<1x1x1xf32, #tpu.memory_space<vmem>>, vector<1x1x1xf32>,
    } else {
    }
    return
  }
  func.func @transform_0(%arg0: i32, %arg1: i32) -> (i32, i32) {
    %c1_i32 = arith.constant 1 : i32
    %0 = arith.muli %arg0, %c1_i32 : i32
    %1 = arith.addi %0, %arg1 : i32
    %c0_i32 = arith.constant 0 : i32
    %c0_i32_0 = arith.constant 0 : i32
    return %1, %c0_i32 : i32, i32
  }
  func.func @transform_1(%arg0: i32, %arg1: i32) -> (i32, i32) {
    %c1_i32 = arith.constant 1 : i32
    %0 = arith.muli %arg0, %c1_i32 : i32
    %1 = arith.addi %0, %arg1 : i32
    %c0_i32 = arith.constant 0 : i32
    %c0_i32_0 = arith.constant 0 : i32
    return %1, %c0_i32 : i32, i32
  }
  func.func @transform_2(%arg0: i32, %arg1: i32) -> (i32, i32) {
    %c0_i32 = arith.constant 0 : i32
    %c0_i32_0 = arith.constant 0 : i32
    %c0_i32_1 = arith.constant 0 : i32
    return %c0_i32, %c0_i32_0 : i32, i32
  }
  func.func @transform_3(%arg0: i32, %arg1: i32) -> (i32, i32) {
    %c0_i32 = arith.constant 0 : i32
    %c0_i32_0 = arith.constant 0 : i32
    %c0_i32_1 = arith.constant 0 : i32
    return %c0_i32, %c0_i32_0 : i32, i32
  }
  func.func @transform_4(%arg0: i32, %arg1: i32) -> (i32, i32, i32) {
    %c0_i32 = arith.constant 0 : i32
    %c0_i32_0 = arith.constant 0 : i32
    %c0_i32_1 = arith.constant 0 : i32
    return %arg0, %c0_i32, %c0_i32_0 : i32, i32, i32
  }
}

</mosaic_0001>

<bundles_post_ra>
// kernel: tpu_custom_call.1
= control target key start
LH: loop header
LB: loop body
LE: loop exit
PB: predicated region body
PF: predicated region fallthrough
CT: control target
= control target key end

     0   :  { %9 = vsyncpa [#allocation4], 0  ;;  %s290_s0 = inlined_call_operand.hbm [shape: f32[12,128], index: 0, kind: input, shape index: {}]   ;;  %s291_s1 = inlined_call_operand.hbm [shape: f32[12,128], index: 1, kind: input, shape index: {}]   ;;  %s292_s2 = inlined_call_operand.vmem [shape: f32[2,1], index: 2, kind: input, shape index: {}]   ;;  %s293_s3 = inlined_call_operand.vmem [shape: f32[2,1], index: 3, kind: input, shape index: {}]   ;;  %s294_s4 = inlined_call_operand.hbm [shape: f32[1,1,1], index: 4, kind: output, shape index: {}]  }
   0x1   :  { %10 = vsyncpa [#allocation7], 0 }
   0x2   :  { %11 = vsyncpa [#allocation5], 0  ;;  %s217_s15 = smov [#allocation3]   ;;  %s145_s19 = scalar_lea.hbm %s290_s0, 256 }
   0x3   :  { %s21_s16 = sshll.u32 %s217_s15, 4  ;;  %p146_p0 = scmp.ne.s32.totalorder %s290_s0, %s145_s19  ;;  %s22_s16 = int_to_ptr.vmem [resolvable:$true] %s21_s16 }
   0x4   :  { %p149_p1 = scmp.lt.u32.totalorder %s145_s19, %s290_s0 }
   0x6   :  { %p151_p2 = pnand %p149_p1, %p146_p0 }
   0x8   :  { %154 = shalt.err (!%p151_p2)
}
   0x9   :  { %s155_s24 = scalar_lea.vmem %s22_s16, 256  ;;  %p160_p4 = scmp.lt.s32.totalorder %s22_s16, %s22_s16 }
   0xa   :  { %p156_p3 = scmp.ne.s32.totalorder %s22_s16, %s155_s24  ;;  %p161_p5 = scmp.lt.s32.totalorder %s155_s24, %s155_s24 }
   0xc   :  { %p162_p6 = por %p161_p5, %p160_p4 }
   0xe   :  { %p163_p7 = pnand %p162_p6, %p156_p3 }
  0x10   :  { %166 = shalt.err (!%p163_p7)
}
  0x11   :  { %s218_s25 = smov 128   ;;  %s219_s26 = smov 8  }
  0x12   :  { %27 = dma.hbm_to_vmem [thread:$0]  %s290_s0, 256, %s22_s16, [#allocation4], %s218_s25, %s218_s25, %s219_s26  }
  0x13   :  { %s220_s29 = smov [#allocation6]   ;;  %s167_s7 = scalar_lea.hbm %s291_s1, 256 }
  0x14   :  { %s37_s30 = sshll.u32 %s220_s29, 4  ;;  %p168_p8 = scmp.ne.s32.totalorder %s291_s1, %s167_s7  ;;  %s38_s30 = int_to_ptr.vmem [resolvable:$true] %s37_s30 }
  0x15   :  { %p171_p9 = scmp.lt.u32.totalorder %s167_s7, %s291_s1 }
  0x17   :  { %p173_p10 = pnand %p171_p9, %p168_p8 }
  0x19   :  { %176 = shalt.err (!%p173_p10)
}
  0x1a   :  { %s177_s12 = scalar_lea.vmem %s38_s30, 256  ;;  %p182_p12 = scmp.lt.s32.totalorder %s38_s30, %s38_s30 }
  0x1b   :  { %p178_p11 = scmp.ne.s32.totalorder %s38_s30, %s177_s12  ;;  %p183_p13 = scmp.lt.s32.totalorder %s177_s12, %s177_s12 }
  0x1d   :  { %p184_p0 = por %p183_p13, %p182_p12 }
  0x1f   :  { %p185_p1 = pnand %p184_p0, %p178_p11 }
  0x21   :  { %188 = shalt.err (!%p185_p1)
}
  0x22   :  { %43 = dma.hbm_to_vmem [thread:$0]  %s291_s1, 256, %s38_s30, [#allocation7], %s218_s25, %s218_s25, %s219_s26  }
  0x23   :  { %211 = dma.done.wait [#allocation4], 256  }
  0x24   :  { %212 = vsyncadd [#allocation4], 4294967040 }
  0x25   :  { %213 = dma.done.wait [#allocation7], 256  }
  0x26   :  { %214 = vsyncadd [#allocation7], 4294967040  ;;  %v221_v0 = vmov 0.0   ;;  %v63_v1 = vld [vmem:[#allocation3] sm:$0xff]  ;;  %v64_v2 = vld [vmem:[#allocation3 + $0x8] sm:$0xf] }
  0x27   :  { %62 = vst [vmem:[#allocation2] sm:$0xff] %v221_v0  ;;  %v65_v3 = vld [vmem:[#allocation6] sm:$0xff]  ;;  %v66_v4 = vld [vmem:[#allocation6 + $0x8] sm:$0xf]  ;;  %vm72_vm0 = vcmask 1043456   ;;  %vm100_vm1 = vcmask 1024  }
  0x28   :  { %v67_v5 = vsub.f32 %v63_v1, %v65_v3  ;;  %v68_v6 = vsub.f32 %v64_v2, %v66_v4  ;;  %v97_v19 = vld [vmem:[%s292_s2] sm:$0x3]  ;;  %s222_s18 = smov [#allocation8]   ;;  %vm117_vm2 = vcmask 0  }
  0x29   :  { %v98_v20 = vld [vmem:[%s293_s3] sm:$0x3]  ;;  %s125_s19 = sshll.u32 %s222_s18, 4  ;;  %s126_s19 = int_to_ptr.vmem [resolvable:$true] %s125_s19 }
  0x2a   :  { %v69_v7 = vand.u32 2147483647, %v67_v5  ;;  %v70_v8 = vand.u32 2147483647, %v68_v6  ;;  %v99_v21 = vsub.f32 %v98_v20, %v97_v19  ;;  %s189_s23 = scalar_lea.vmem %s126_s19, 16  ;;  %s193_s24 = scalar_lea.vmem %s126_s19, 32 }
  0x2b   :  { %p190_p2 = scmp.ne.s32.totalorder %s126_s19, %s189_s23  ;;  %p194_p3 = scmp.lt.s32.totalorder %s126_s19, %s126_s19 }
  0x2c   :  { %v73_v9 = vsel %vm72_vm0, %v70_v8, 0.0  ;;  %v101_v23 = vsel %vm100_vm1, %v99_v21, 0.0  ;;  %p195_p4 = scmp.lt.s32.totalorder %s193_s24, %s189_s23 }
  0x2d   :  { %v74_v10 = vadd.f32 %v73_v9, %v69_v7 }
  0x2e   :  { %v71_v16 = vld [vmem:[#allocation2] sm:$0x1]  ;;  %p196_p5 = por %p195_p4, %p194_p3 }
  0x2f   :  { %v75_v11 = vrot.slane %v74_v10, 4 }
  0x30   :  { %p197_p6 = pnand %p196_p5, %p190_p2 }
  0x31   :  { %v76_v12 = vadd.f32 %v75_v11, %v74_v10 }
  0x33   :  { %v77_v13 = vrot.slane %v76_v12, 2 }
  0x35   :  { %v78_v14 = vadd.f32 %v77_v13, %v76_v12 }
  0x37   :  { %v79_v15 = vrot.slane %v78_v14, 1 }
  0x39   :  { %v80_v17 = vadd.f32 %v79_v15, %v78_v14 }
  0x3b   :  { %v81_v18 = vadd.f32 %v80_v17, %v71_v16 }
  0x3d   :  { %82 = vst [vmem:[#allocation2] sm:$0x1] %v81_v18 }
  0x44   :  { %v86_v22 = vld [vmem:[#allocation2] sm:$0xff] }
  0x45   :  { %87 = vadd.xlane.f32.xlu0 %v86_v22 }
  0x49   :  { %102 = vadd.xlane.f32.xlu0 %v101_v23 }
  0xd2   :  { %v88_v24 = vpop.xlane.xlu0 %87 }
  0xd3   :  { %v89_v25 = vrot.slane %v88_v24, 4 }
  0xd5   :  { %v90_v26 = vadd.f32 %v89_v25, %v88_v24 }
  0xd6   :  { %v103_v27 = vpop.xlane.xlu0 %102 }
  0xd7   :  { %v91_v28 = vrot.slane %v90_v26, 2  ;;  %v104_v29 = vrot.slane %v103_v27, 4 }
  0xd9   :  { %v105_v30 = vadd.f32 %v104_v29, %v103_v27  ;;  %v92_v31 = vadd.f32 %v91_v28, %v90_v26 }
  0xdb   :  { %v106_v32 = vrot.slane %v105_v30, 2  ;;  %v93_v33 = vrot.slane %v92_v31, 1 }
  0xdd   :  { %v107_v34 = vadd.f32 %v106_v32, %v105_v30  ;;  %v94_v35 = vadd.f32 %v93_v33, %v92_v31 }
  0xdf   :  { %135 = vpush %v94_v35  ;;  %v108_v36 = vrot.slane %v107_v34, 1 }
  0xe1   :  { %v109_v37 = vadd.f32 %v108_v36, %v107_v34 }
  0xe3   :  { %137 = vpush %v109_v37 }
 0x110   :  { %s136_s2 = spop %135 }
 0x111   :  { %s96_s20 = smul.f32 0.00026041668, %s136_s2 }
 0x114   :  { %s138_s3 = spop %137 }
 0x115   :  { %s111_s17 = smul.f32 0.3, %s138_s3 }
 0x117   :  { %s112_s21 = sadd.f32 0.6, %s111_s17 }
 0x119   :  { %s115_s22 = sadd.f32 %s112_s21, %s96_s20 }
 0x11b   :  { %v116_v38 = vstv %s115_s22 }
 0x11c   :  { %118 = vst.msk [vmem:[#allocation8] sm:$0x1] %vm117_vm2, %v116_v38 }
 0x11d   :  { %200 = shalt.err (!%p197_p6)
}
 0x11e   :  { %s201_s27 = scalar_lea.hbm %s294_s4, 16 }
 0x11f   :  { %p202_p7 = scmp.ne.s32.totalorder %s294_s4, %s201_s27  ;;  %p205_p8 = scmp.lt.u32.totalorder %s201_s27, %s294_s4 }
 0x121   :  { %p207_p9 = pnand %p205_p8, %p202_p7 }
 0x123   :  { %210 = shalt.err (!%p207_p9)
}
 0x124   :  { %128 = dma.vmem_to_hbm [thread:$0]  %s126_s19, 16, %s294_s4, [#allocation5]  }
 0x125   :  { %215 = dma.done.wait [#allocation5], 16  }
 0x126   :  { %216 = vsyncadd [#allocation5], 4294967280 }
 0x127   :  { %132 = vsyncpa [#allocation4], 1 }
 0x128   :  { %133 = vsyncpa [#allocation7], 1 }
 0x129   :  { %134 = vsyncpa [#allocation5], 1 }

</bundles_post_ra>
